<compile_context>
chip_gen: v7x
topology: tpu7x:2x2x1
jax: 0.10.0
libtpu: 0.0.40
codegen_flags: <defaults>
</compile_context>

<pallas_src>
import functools

import jax
import jax.numpy as jnp
from jax import lax
from jax.experimental import pallas as pl
from jax.experimental.pallas import tpu as pltpu

EPS = 1e-5
MXU_DTYPE = jnp.bfloat16   # jnp.float32 for exact-f32 MXU operands (slower, bit-faithful)


def _bn_train(y, gamma, beta):
    """PyTorch training-mode BatchNorm over the lane (pixel) axis of a (C, M) slab."""
    m = y.shape[1]
    inv_m = 1.0 / m
    mean = jnp.sum(y, axis=1, keepdims=True) * inv_m
    ex2 = jnp.sum(y * y, axis=1, keepdims=True) * inv_m
    var = ex2 - mean * mean            # single-pass stats; fine in f32 at this tolerance
    scale = gamma * lax.rsqrt(var + EPS)
    shift = beta - mean * scale
    return y * scale + shift


def _im2col_into(patch_ref, src, mask_ref, k, W):
    """Fill patch_ref (k*k*C, M) with the k*k shifted+masked copies of src (C, M).

    Column m of the patch buffer is output pixel m = n*H*W + y*W + x; its (dy, dx) tap
    lives at column m + (dy-p)*W + (dx-p) of src, so each tap is one static lane roll
    (XLU) plus a 0/1 zero-padding mask multiply (VPU) and a dense sublane-aligned store.
    Lane wrap-around of the roll only ever lands on masked-out (zero-padded) columns.
    """
    C, M = src.shape
    p = (k - 1) // 2
    for dy in range(k):
        for dx in range(k):
            tap = dy * k + dx
            d = (dy - p) * W + (dx - p)
            if d == 0:
                tap_val = src                                   # centre tap, always valid
            else:
                rolled = pltpu.roll(src, shift=(-d) % M, axis=1)
                tap_val = rolled * mask_ref[tap:tap + 1, :]
            patch_ref[tap * C:(tap + 1) * C, :] = tap_val.astype(patch_ref.dtype)


def _resblock_kernel(k, W, x_ref, mask_ref, w1_ref, b1_ref, g1_ref, be1_ref,
                     w2_ref, b2_ref, g2_ref, be2_ref, out_ref, patch_ref):
    x = x_ref[...]                                              # (C, M) f32, lane-dense

    # ---- conv1: roll+mask im2col -> single MXU matmul (weights as LHS) + bias + relu ----
    _im2col_into(patch_ref, x, mask_ref, k, W)
    y = jnp.dot(w1_ref[...], patch_ref[...], preferred_element_type=jnp.float32)
    y = jnp.maximum(y + b1_ref[...], 0.0)

    # ---- bn1 (kept explicit: conv2 zero-pads bn1's OUTPUT, so folding would be wrong) ----
    y = _bn_train(y, g1_ref[...], be1_ref[...])

    # ---- conv2: same scheme, reusing the same patch scratch ----
    _im2col_into(patch_ref, y, mask_ref, k, W)
    y2 = jnp.dot(w2_ref[...], patch_ref[...], preferred_element_type=jnp.float32)
    y2 = jnp.maximum(y2 + b2_ref[...], 0.0)

    # ---- residual straight from the (unpadded, f32) input, then bn2 ----
    y2 = y2 + x
    out_ref[...] = _bn_train(y2, g2_ref[...], be2_ref[...])


@functools.partial(jax.jit, static_argnames=("kernel_size",))
def resblock1_pallas(x_nchw, params, kernel_size):
    """x_nchw: (N, 32, H, W) float32 -> (N, 32, H, W) float32 (PyTorch forward semantics)."""
    w1, b1, g1, be1, w2, b2, g2, be2 = params
    k = kernel_size
    p = (k - 1) // 2
    N, C, H, W = x_nchw.shape
    M = N * H * W
    KKC = k * k * C

    # Channels-first, pixels-on-lanes layout: x_cm[c, n*H*W + y*W + x] = x[n, c, y, x].
    x_cm = jnp.transpose(x_nchw, (1, 0, 2, 3)).reshape(C, M).astype(jnp.float32)

    # Per-tap zero-padding masks over the flattened pixel (lane) axis, hoisted to the host.
    pix = jnp.arange(M, dtype=jnp.int32)
    yy = (pix // W) % H
    xx = pix % W
    mask_rows = []
    for dy in range(k):
        for dx in range(k):
            oy, ox = dy - p, dx - p
            mask_rows.append((yy + oy >= 0) & (yy + oy < H) &
                             (xx + ox >= 0) & (xx + ox < W))
    masks = jnp.stack(mask_rows).astype(jnp.float32)            # (k*k, M)

    # Weights as the matmul LHS: wt[co, (dy*k+dx)*C + ci] = w_hwio[dy, dx, ci, co].
    w1t = jnp.transpose(w1, (3, 0, 1, 2)).reshape(C, KKC).astype(MXU_DTYPE)
    w2t = jnp.transpose(w2, (3, 0, 1, 2)).reshape(C, KKC).astype(MXU_DTYPE)
    col = lambda v: v.reshape(C, 1).astype(jnp.float32)         # per-channel vectors

    # Size the VMEM request from actual usage; cap at 48 MiB (v7x has only 64 MiB per TC).
    mxu_bytes = 2 if MXU_DTYPE == jnp.bfloat16 else 4
    est = (2 * (2 * C * M * 4 + 2 * C * KKC * mxu_bytes + k * k * M * 4)
           + KKC * M * mxu_bytes + 6 * C * M * 4)
    vmem_limit = int(min(max(2 * est, 32 << 20), 48 << 20))

    vmem = pl.BlockSpec(memory_space=pltpu.MemorySpace.VMEM)
    out_cm = pl.pallas_call(
        functools.partial(_resblock_kernel, k, W),
        out_shape=jax.ShapeDtypeStruct((C, M), jnp.float32),    # lane-dense output
        in_specs=[vmem] * 10,
        out_specs=vmem,
        scratch_shapes=[pltpu.VMEM((KKC, M), MXU_DTYPE)],       # shared conv1/conv2 patches
        compiler_params=pltpu.CompilerParams(vmem_limit_bytes=vmem_limit),
    )(x_cm, masks, w1t, col(b1), col(g1), col(be1), w2t, col(b2), col(g2), col(be2))

    return jnp.transpose(out_cm.reshape(C, N, H, W), (1, 0, 2, 3))


# ---------------------------------------------------------------------------
# Pure-JAX reference matching the PyTorch forward (training-mode BatchNorm).
# ---------------------------------------------------------------------------
def _bn_train_ref(y_nhwc, gamma, beta):
    mean = jnp.mean(y_nhwc, axis=(0, 1, 2), keepdims=True)
    var = jnp.mean((y_nhwc - mean) ** 2, axis=(0, 1, 2), keepdims=True)
    return (y_nhwc - mean) * lax.rsqrt(var + EPS) * gamma + beta


def _conv_ref(x_nhwc, w_hwio, p):
    return lax.conv_general_dilated(
        x_nhwc, w_hwio, (1, 1), [(p, p), (p, p)],
        dimension_numbers=("NHWC", "HWIO", "NHWC"),
        precision=lax.Precision.HIGHEST)


def _reference(x_nchw, params, kernel_size, mxu_dtype=None):
    """PyTorch-semantics forward. If mxu_dtype is set, conv inputs/weights are rounded to
    it (residual and accumulation stay f32), mirroring the kernel's mixed-precision MXU."""
    w1, b1, g1, be1, w2, b2, g2, be2 = params
    p = (kernel_size - 1) // 2
    q = (lambda a: a.astype(mxu_dtype).astype(jnp.float32)) if mxu_dtype else (lambda a: a)
    x = jnp.transpose(x_nchw, (0, 2, 3, 1))
    y = jnp.maximum(_conv_ref(q(x), q(w1), p) + b1, 0.0)
    y = _bn_train_ref(y, g1, be1)
    y = jnp.maximum(_conv_ref(q(y), q(w2), p) + b2, 0.0)
    y = y + x                       # residual uses the exact f32 input, like the kernel
    y = _bn_train_ref(y, g2, be2)
    return jnp.transpose(y, (0, 3, 1, 2))


def make_params(key, kernel_size, channels=32):
    """Deterministic synthetic parameters. Conv weights stored HWIO (k, k, Cin, Cout)."""
    k1, k2, k3, k4 = jax.random.split(key, 4)
    scale = 1.0 / (channels * kernel_size * kernel_size) ** 0.5
    w1 = jax.random.normal(k1, (kernel_size, kernel_size, channels, channels),
                           jnp.float32) * scale
    b1 = jax.random.normal(k2, (channels,), jnp.float32) * scale
    w2 = jax.random.normal(k3, (kernel_size, kernel_size, channels, channels),
                           jnp.float32) * scale
    b2 = jax.random.normal(k4, (channels,), jnp.float32) * scale
    g1 = jnp.ones((channels,), jnp.float32)     # BatchNorm weight init
    be1 = jnp.zeros((channels,), jnp.float32)   # BatchNorm bias init
    g2 = jnp.ones((channels,), jnp.float32)
    be2 = jnp.zeros((channels,), jnp.float32)
    return (w1, b1, g1, be1, w2, b2, g2, be2)


if __name__ == "__main__":
    kernel_size = 3
    N, C, H, W = 2, 32, 8, 8        # ResBlock1 is fixed to 32 channels

    key = jax.random.PRNGKey(0)
    kx, kp = jax.random.split(key)
    x = jax.random.normal(kx, (N, C, H, W), jnp.float32)
    params = make_params(kp, kernel_size, C)

    out = resblock1_pallas(x, params, kernel_size)
    out = jax.block_until_ready(out)
    assert out.shape == (N, C, H, W)

    # Structural check: reference with the SAME bf16-rounded conv operands -> tight match.
    ref_q = _reference(x, params, kernel_size, mxu_dtype=MXU_DTYPE)
    err_q = float(jnp.max(jnp.abs(out - ref_q)))
    assert err_q < 2e-3, f"mismatch vs matched-precision reference: {err_q}"

    # End-to-end check vs the exact f32 PyTorch-semantics forward; bf16 MXU operands keep
    # the max abs error well under this bound at these magnitudes.
    ref = _reference(x, params, kernel_size)
    err = float(jnp.max(jnp.abs(out - ref)))
    assert err < 5e-2, f"mismatch vs exact f32 reference: {err}"

    print("KERNEL_OK")
</pallas_src>

<mosaic_0001>
module attributes {stable_mosaic.version = 11 : i64} {
  func.func @_resblock_kernel(%arg0: memref<32x128xf32, #tpu.memory_space<vmem>>, %arg1: memref<9x128xf32, #tpu.memory_space<vmem>>, %arg2: memref<32x288xbf16, #tpu.memory_space<vmem>>, %arg3: memref<32x1xf32, #tpu.memory_space<vmem>>, %arg4: memref<32x1xf32, #tpu.memory_space<vmem>>, %arg5: memref<32x1xf32, #tpu.memory_space<vmem>>, %arg6: memref<32x288xbf16, #tpu.memory_space<vmem>>, %arg7: memref<32x1xf32, #tpu.memory_space<vmem>>, %arg8: memref<32x1xf32, #tpu.memory_space<vmem>>, %arg9: memref<32x1xf32, #tpu.memory_space<vmem>>, %arg10: memref<32x128xf32, #tpu.memory_space<vmem>>, %arg11: memref<288x128xbf16, #tpu.memory_space<vmem>>) attributes {dimension_semantics = [], scalar_prefetch = 0 : i64, scratch_operands = 1 : i64, tpu.core_type = #tpu.core_type<tc>} {
    %c0 = arith.constant 0 : index
    %c0_0 = arith.constant 0 : index
    %0 = vector.load %arg0[%c0, %c0_0] : memref<32x128xf32, #tpu.memory_space<vmem>>, vector<32x128xf32>
    %c9_i32 = arith.constant 9 : i32
    %1 = tpu.dynamic_rotate %0 by %c9_i32 dim 1 : vector<32x128xf32>, i32 -> vector<32x128xf32>
    %c0_1 = arith.constant 0 : index
    %c0_2 = arith.constant 0 : index
    %2 = vector.load %arg1[%c0_1, %c0_2] : memref<9x128xf32, #tpu.memory_space<vmem>>, vector<1x128xf32>
    %3 = vector.broadcast %2 : vector<1x128xf32> to vector<32x128xf32>
    %4 = arith.mulf %1, %3 : vector<32x128xf32>
    %5 = arith.truncf %4 : vector<32x128xf32> to vector<32x128xbf16>
    %c0_3 = arith.constant 0 : index
    %c0_4 = arith.constant 0 : index
    %6 = vector.load %arg11[%c0_3, %c0_4] : memref<288x128xbf16, #tpu.memory_space<vmem>>, vector<32x128xbf16>
    tpu.vector_store %arg11[%c0_3, %c0_4], %5 {strides = array<i32>} : memref<288x128xbf16, #tpu.memory_space<vmem>>, vector<32x128xbf16>,
    %c8_i32 = arith.constant 8 : i32
    %7 = tpu.dynamic_rotate %0 by %c8_i32 dim 1 : vector<32x128xf32>, i32 -> vector<32x128xf32>
    %c1 = arith.constant 1 : index
    %c0_5 = arith.constant 0 : index
    %8 = vector.load %arg1[%c1, %c0_5] : memref<9x128xf32, #tpu.memory_space<vmem>>, vector<1x128xf32>
    %9 = vector.broadcast %8 : vector<1x128xf32> to vector<32x128xf32>
    %10 = arith.mulf %7, %9 : vector<32x128xf32>
    %11 = arith.truncf %10 : vector<32x128xf32> to vector<32x128xbf16>
    %c32 = arith.constant 32 : index
    %c0_6 = arith.constant 0 : index
    %12 = vector.load %arg11[%c32, %c0_6] : memref<288x128xbf16, #tpu.memory_space<vmem>>, vector<32x128xbf16>
    tpu.vector_store %arg11[%c32, %c0_6], %11 {strides = array<i32>} : memref<288x128xbf16, #tpu.memory_space<vmem>>, vector<32x128xbf16>,
    %c7_i32 = arith.constant 7 : i32
    %13 = tpu.dynamic_rotate %0 by %c7_i32 dim 1 : vector<32x128xf32>, i32 -> vector<32x128xf32>
    %c2 = arith.constant 2 : index
    %c0_7 = arith.constant 0 : index
    %14 = vector.load %arg1[%c2, %c0_7] : memref<9x128xf32, #tpu.memory_space<vmem>>, vector<1x128xf32>
    %15 = vector.broadcast %14 : vector<1x128xf32> to vector<32x128xf32>
    %16 = arith.mulf %13, %15 : vector<32x128xf32>
    %17 = arith.truncf %16 : vector<32x128xf32> to vector<32x128xbf16>
    %c64 = arith.constant 64 : index
    %c0_8 = arith.constant 0 : index
    %18 = vector.load %arg11[%c64, %c0_8] : memref<288x128xbf16, #tpu.memory_space<vmem>>, vector<32x128xbf16>
    tpu.vector_store %arg11[%c64, %c0_8], %17 {strides = array<i32>} : memref<288x128xbf16, #tpu.memory_space<vmem>>, vector<32x128xbf16>,
    %c1_i32 = arith.constant 1 : i32
    %19 = tpu.dynamic_rotate %0 by %c1_i32 dim 1 : vector<32x128xf32>, i32 -> vector<32x128xf32>
    %c3 = arith.constant 3 : index
    %c0_9 = arith.constant 0 : index
    %20 = vector.load %arg1[%c3, %c0_9] : memref<9x128xf32, #tpu.memory_space<vmem>>, vector<1x128xf32>
    %21 = vector.broadcast %20 : vector<1x128xf32> to vector<32x128xf32>
    %22 = arith.mulf %19, %21 : vector<32x128xf32>
    %23 = arith.truncf %22 : vector<32x128xf32> to vector<32x128xbf16>
    %c96 = arith.constant 96 : index
    %c0_10 = arith.constant 0 : index
    %24 = vector.load %arg11[%c96, %c0_10] : memref<288x128xbf16, #tpu.memory_space<vmem>>, vector<32x128xbf16>
    tpu.vector_store %arg11[%c96, %c0_10], %23 {strides = array<i32>} : memref<288x128xbf16, #tpu.memory_space<vmem>>, vector<32x128xbf16>,
    %25 = arith.truncf %0 : vector<32x128xf32> to vector<32x128xbf16>
    %c128 = arith.constant 128 : index
    %c0_11 = arith.constant 0 : index
    %26 = vector.load %arg11[%c128, %c0_11] : memref<288x128xbf16, #tpu.memory_space<vmem>>, vector<32x128xbf16>
    tpu.vector_store %arg11[%c128, %c0_11], %25 {strides = array<i32>} : memref<288x128xbf16, #tpu.memory_space<vmem>>, vector<32x128xbf16>,
    %c127_i32 = arith.constant 127 : i32
    %27 = tpu.dynamic_rotate %0 by %c127_i32 dim 1 : vector<32x128xf32>, i32 -> vector<32x128xf32>
    %c5 = arith.constant 5 : index
    %c0_12 = arith.constant 0 : index
    %28 = vector.load %arg1[%c5, %c0_12] : memref<9x128xf32, #tpu.memory_space<vmem>>, vector<1x128xf32>
    %29 = vector.broadcast %28 : vector<1x128xf32> to vector<32x128xf32>
    %30 = arith.mulf %27, %29 : vector<32x128xf32>
    %31 = arith.truncf %30 : vector<32x128xf32> to vector<32x128xbf16>
    %c160 = arith.constant 160 : index
    %c0_13 = arith.constant 0 : index
    %32 = vector.load %arg11[%c160, %c0_13] : memref<288x128xbf16, #tpu.memory_space<vmem>>, vector<32x128xbf16>
    tpu.vector_store %arg11[%c160, %c0_13], %31 {strides = array<i32>} : memref<288x128xbf16, #tpu.memory_space<vmem>>, vector<32x128xbf16>,
    %c121_i32 = arith.constant 121 : i32
    %33 = tpu.dynamic_rotate %0 by %c121_i32 dim 1 : vector<32x128xf32>, i32 -> vector<32x128xf32>
    %c6 = arith.constant 6 : index
    %c0_14 = arith.constant 0 : index
    %34 = vector.load %arg1[%c6, %c0_14] : memref<9x128xf32, #tpu.memory_space<vmem>>, vector<1x128xf32>
    %35 = vector.broadcast %34 : vector<1x128xf32> to vector<32x128xf32>
    %36 = arith.mulf %33, %35 : vector<32x128xf32>
    %37 = arith.truncf %36 : vector<32x128xf32> to vector<32x128xbf16>
    %c192 = arith.constant 192 : index
    %c0_15 = arith.constant 0 : index
    %38 = vector.load %arg11[%c192, %c0_15] : memref<288x128xbf16, #tpu.memory_space<vmem>>, vector<32x128xbf16>
    tpu.vector_store %arg11[%c192, %c0_15], %37 {strides = array<i32>} : memref<288x128xbf16, #tpu.memory_space<vmem>>, vector<32x128xbf16>,
    %c120_i32 = arith.constant 120 : i32
    %39 = tpu.dynamic_rotate %0 by %c120_i32 dim 1 : vector<32x128xf32>, i32 -> vector<32x128xf32>
    %c7 = arith.constant 7 : index
    %c0_16 = arith.constant 0 : index
    %40 = vector.load %arg1[%c7, %c0_16] : memref<9x128xf32, #tpu.memory_space<vmem>>, vector<1x128xf32>
    %41 = vector.broadcast %40 : vector<1x128xf32> to vector<32x128xf32>
    %42 = arith.mulf %39, %41 : vector<32x128xf32>
    %43 = arith.truncf %42 : vector<32x128xf32> to vector<32x128xbf16>
    %c224 = arith.constant 224 : index
    %c0_17 = arith.constant 0 : index
    %44 = vector.load %arg11[%c224, %c0_17] : memref<288x128xbf16, #tpu.memory_space<vmem>>, vector<32x128xbf16>
    tpu.vector_store %arg11[%c224, %c0_17], %43 {strides = array<i32>} : memref<288x128xbf16, #tpu.memory_space<vmem>>, vector<32x128xbf16>,
    %c119_i32 = arith.constant 119 : i32
    %45 = tpu.dynamic_rotate %0 by %c119_i32 dim 1 : vector<32x128xf32>, i32 -> vector<32x128xf32>
    %c8 = arith.constant 8 : index
    %c0_18 = arith.constant 0 : index
    %46 = vector.load %arg1[%c8, %c0_18] : memref<9x128xf32, #tpu.memory_space<vmem>>, vector<1x128xf32>
    %47 = vector.broadcast %46 : vector<1x128xf32> to vector<32x128xf32>
    %48 = arith.mulf %45, %47 : vector<32x128xf32>
    %49 = arith.truncf %48 : vector<32x128xf32> to vector<32x128xbf16>
    %c256 = arith.constant 256 : index
    %c0_19 = arith.constant 0 : index
    %50 = vector.load %arg11[%c256, %c0_19] : memref<288x128xbf16, #tpu.memory_space<vmem>>, vector<32x128xbf16>
    tpu.vector_store %arg11[%c256, %c0_19], %49 {strides = array<i32>} : memref<288x128xbf16, #tpu.memory_space<vmem>>, vector<32x128xbf16>,
    %c0_20 = arith.constant 0 : index
    %c0_21 = arith.constant 0 : index
    %51 = vector.load %arg2[%c0_20, %c0_21] : memref<32x288xbf16, #tpu.memory_space<vmem>>, vector<32x288xbf16>
    %c0_22 = arith.constant 0 : index
    %c0_23 = arith.constant 0 : index
    %52 = vector.load %arg11[%c0_22, %c0_23] : memref<288x128xbf16, #tpu.memory_space<vmem>>, vector<288x128xbf16>
    %cst = arith.constant dense<0.000000e+00> : vector<32x128xf32>
    %53 = tpu.matmul %51, %52, %cst {dimension_numbers = #tpu.dot_dimension_numbers<[1], [0], [0], [1], [0, 0, 1, 1], [], []>} : vector<32x288xbf16>, vector<288x128xbf16>, vector<32x128xf32> -> vector<32x128xf32>
    %c0_24 = arith.constant 0 : index
    %c0_25 = arith.constant 0 : index
    %54 = vector.load %arg3[%c0_24, %c0_25] : memref<32x1xf32, #tpu.memory_space<vmem>>, vector<32x1xf32>
    %55 = vector.broadcast %54 : vector<32x1xf32> to vector<32x128xf32>
    %56 = arith.addf %53, %55 : vector<32x128xf32>
    %cst_26 = arith.constant 0.000000e+00 : f32
    %57 = vector.broadcast %cst_26 : f32 to vector<32x128xf32>
    %58 = arith.maximumf %56, %57 : vector<32x128xf32>
    %c0_27 = arith.constant 0 : index
    %c0_28 = arith.constant 0 : index
    %59 = vector.load %arg4[%c0_27, %c0_28] : memref<32x1xf32, #tpu.memory_space<vmem>>, vector<32x1xf32>
    %c0_29 = arith.constant 0 : index
    %c0_30 = arith.constant 0 : index
    %60 = vector.load %arg5[%c0_29, %c0_30] : memref<32x1xf32, #tpu.memory_space<vmem>>, vector<32x1xf32>
    %cst_31 = arith.constant dense<0.000000e+00> : vector<32xf32>
    %61 = vector.multi_reduction <add>, %58, %cst_31 [1] : vector<32x128xf32> to vector<32xf32>
    %62 = vector.shape_cast %61 : vector<32xf32> to vector<32x1xf32>
    %cst_32 = arith.constant 7.812500e-03 : f32
    %63 = vector.broadcast %cst_32 : f32 to vector<32x1xf32>
    %64 = arith.mulf %62, %63 : vector<32x1xf32>
    %65 = arith.mulf %58, %58 : vector<32x128xf32>
    %cst_33 = arith.constant dense<0.000000e+00> : vector<32xf32>
    %66 = vector.multi_reduction <add>, %65, %cst_33 [1] : vector<32x128xf32> to vector<32xf32>
    %67 = vector.shape_cast %66 : vector<32xf32> to vector<32x1xf32>
    %cst_34 = arith.constant 7.812500e-03 : f32
    %68 = vector.broadcast %cst_34 : f32 to vector<32x1xf32>
    %69 = arith.mulf %67, %68 : vector<32x1xf32>
    %70 = arith.mulf %64, %64 : vector<32x1xf32>
    %71 = arith.subf %69, %70 : vector<32x1xf32>
    %cst_35 = arith.constant 9.99999974E-6 : f32
    %72 = vector.broadcast %cst_35 : f32 to vector<32x1xf32>
    %73 = arith.addf %71, %72 : vector<32x1xf32>
    %74 = math.rsqrt %73 : vector<32x1xf32>
    %75 = arith.mulf %59, %74 : vector<32x1xf32>
    %76 = arith.mulf %64, %75 : vector<32x1xf32>
    %77 = arith.subf %60, %76 : vector<32x1xf32>
    %78 = vector.broadcast %75 : vector<32x1xf32> to vector<32x128xf32>
    %79 = arith.mulf %58, %78 : vector<32x128xf32>
    %80 = vector.broadcast %77 : vector<32x1xf32> to vector<32x128xf32>
    %81 = arith.addf %79, %80 : vector<32x128xf32>
    %c9_i32_36 = arith.constant 9 : i32
    %82 = tpu.dynamic_rotate %81 by %c9_i32_36 dim 1 : vector<32x128xf32>, i32 -> vector<32x128xf32>
    %c0_37 = arith.constant 0 : index
    %c0_38 = arith.constant 0 : index
    %83 = vector.load %arg1[%c0_37, %c0_38] : memref<9x128xf32, #tpu.memory_space<vmem>>, vector<1x128xf32>
    %84 = vector.broadcast %83 : vector<1x128xf32> to vector<32x128xf32>
    %85 = arith.mulf %82, %84 : vector<32x128xf32>
    %86 = arith.truncf %85 : vector<32x128xf32> to vector<32x128xbf16>
    %c0_39 = arith.constant 0 : index
    %c0_40 = arith.constant 0 : index
    %87 = vector.load %arg11[%c0_39, %c0_40] : memref<288x128xbf16, #tpu.memory_space<vmem>>, vector<32x128xbf16>
    tpu.vector_store %arg11[%c0_39, %c0_40], %86 {strides = array<i32>} : memref<288x128xbf16, #tpu.memory_space<vmem>>, vector<32x128xbf16>,
    %c8_i32_41 = arith.constant 8 : i32
    %88 = tpu.dynamic_rotate %81 by %c8_i32_41 dim 1 : vector<32x128xf32>, i32 -> vector<32x128xf32>
    %c1_42 = arith.constant 1 : index
    %c0_43 = arith.constant 0 : index
    %89 = vector.load %arg1[%c1_42, %c0_43] : memref<9x128xf32, #tpu.memory_space<vmem>>, vector<1x128xf32>
    %90 = vector.broadcast %89 : vector<1x128xf32> to vector<32x128xf32>
    %91 = arith.mulf %88, %90 : vector<32x128xf32>
    %92 = arith.truncf %91 : vector<32x128xf32> to vector<32x128xbf16>
    %c32_44 = arith.constant 32 : index
    %c0_45 = arith.constant 0 : index
    %93 = vector.load %arg11[%c32_44, %c0_45] : memref<288x128xbf16, #tpu.memory_space<vmem>>, vector<32x128xbf16>
    tpu.vector_store %arg11[%c32_44, %c0_45], %92 {strides = array<i32>} : memref<288x128xbf16, #tpu.memory_space<vmem>>, vector<32x128xbf16>,
    %c7_i32_46 = arith.constant 7 : i32
    %94 = tpu.dynamic_rotate %81 by %c7_i32_46 dim 1 : vector<32x128xf32>, i32 -> vector<32x128xf32>
    %c2_47 = arith.constant 2 : index
    %c0_48 = arith.constant 0 : index
    %95 = vector.load %arg1[%c2_47, %c0_48] : memref<9x128xf32, #tpu.memory_space<vmem>>, vector<1x128xf32>
    %96 = vector.broadcast %95 : vector<1x128xf32> to vector<32x128xf32>
    %97 = arith.mulf %94, %96 : vector<32x128xf32>
    %98 = arith.truncf %97 : vector<32x128xf32> to vector<32x128xbf16>
    %c64_49 = arith.constant 64 : index
    %c0_50 = arith.constant 0 : index
    %99 = vector.load %arg11[%c64_49, %c0_50] : memref<288x128xbf16, #tpu.memory_space<vmem>>, vector<32x128xbf16>
    tpu.vector_store %arg11[%c64_49, %c0_50], %98 {strides = array<i32>} : memref<288x128xbf16, #tpu.memory_space<vmem>>, vector<32x128xbf16>,
    %c1_i32_51 = arith.constant 1 : i32
    %100 = tpu.dynamic_rotate %81 by %c1_i32_51 dim 1 : vector<32x128xf32>, i32 -> vector<32x128xf32>
    %c3_52 = arith.constant 3 : index
    %c0_53 = arith.constant 0 : index
    %101 = vector.load %arg1[%c3_52, %c0_53] : memref<9x128xf32, #tpu.memory_space<vmem>>, vector<1x128xf32>
    %102 = vector.broadcast %101 : vector<1x128xf32> to vector<32x128xf32>
    %103 = arith.mulf %100, %102 : vector<32x128xf32>
    %104 = arith.truncf %103 : vector<32x128xf32> to vector<32x128xbf16>
    %c96_54 = arith.constant 96 : index
    %c0_55 = arith.constant 0 : index
    %105 = vector.load %arg11[%c96_54, %c0_55] : memref<288x128xbf16, #tpu.memory_space<vmem>>, vector<32x128xbf16>
    tpu.vector_store %arg11[%c96_54, %c0_55], %104 {strides = array<i32>} : memref<288x128xbf16, #tpu.memory_space<vmem>>, vector<32x128xbf16>,
    %106 = arith.truncf %81 : vector<32x128xf32> to vector<32x128xbf16>
    %c128_56 = arith.constant 128 : index
    %c0_57 = arith.constant 0 : index
    %107 = vector.load %arg11[%c128_56, %c0_57] : memref<288x128xbf16, #tpu.memory_space<vmem>>, vector<32x128xbf16>
    tpu.vector_store %arg11[%c128_56, %c0_57], %106 {strides = array<i32>} : memref<288x128xbf16, #tpu.memory_space<vmem>>, vector<32x128xbf16>,
    %c127_i32_58 = arith.constant 127 : i32
    %108 = tpu.dynamic_rotate %81 by %c127_i32_58 dim 1 : vector<32x128xf32>, i32 -> vector<32x128xf32>
    %c5_59 = arith.constant 5 : index
    %c0_60 = arith.constant 0 : index
    %109 = vector.load %arg1[%c5_59, %c0_60] : memref<9x128xf32, #tpu.memory_space<vmem>>, vector<1x128xf32>
    %110 = vector.broadcast %109 : vector<1x128xf32> to vector<32x128xf32>
    %111 = arith.mulf %108, %110 : vector<32x128xf32>
    %112 = arith.truncf %111 : vector<32x128xf32> to vector<32x128xbf16>
    %c160_61 = arith.constant 160 : index
    %c0_62 = arith.constant 0 : index
    %113 = vector.load %arg11[%c160_61, %c0_62] : memref<288x128xbf16, #tpu.memory_space<vmem>>, vector<32x128xbf16>
    tpu.vector_store %arg11[%c160_61, %c0_62], %112 {strides = array<i32>} : memref<288x128xbf16, #tpu.memory_space<vmem>>, vector<32x128xbf16>,
    %c121_i32_63 = arith.constant 121 : i32
    %114 = tpu.dynamic_rotate %81 by %c121_i32_63 dim 1 : vector<32x128xf32>, i32 -> vector<32x128xf32>
    %c6_64 = arith.constant 6 : index
    %c0_65 = arith.constant 0 : index
    %115 = vector.load %arg1[%c6_64, %c0_65] : memref<9x128xf32, #tpu.memory_space<vmem>>, vector<1x128xf32>
    %116 = vector.broadcast %115 : vector<1x128xf32> to vector<32x128xf32>
    %117 = arith.mulf %114, %116 : vector<32x128xf32>
    %118 = arith.truncf %117 : vector<32x128xf32> to vector<32x128xbf16>
    %c192_66 = arith.constant 192 : index
    %c0_67 = arith.constant 0 : index
    %119 = vector.load %arg11[%c192_66, %c0_67] : memref<288x128xbf16, #tpu.memory_space<vmem>>, vector<32x128xbf16>
    tpu.vector_store %arg11[%c192_66, %c0_67], %118 {strides = array<i32>} : memref<288x128xbf16, #tpu.memory_space<vmem>>, vector<32x128xbf16>,
    %c120_i32_68 = arith.constant 120 : i32
    %120 = tpu.dynamic_rotate %81 by %c120_i32_68 dim 1 : vector<32x128xf32>, i32 -> vector<32x128xf32>
    %c7_69 = arith.constant 7 : index
    %c0_70 = arith.constant 0 : index
    %121 = vector.load %arg1[%c7_69, %c0_70] : memref<9x128xf32, #tpu.memory_space<vmem>>, vector<1x128xf32>
    %122 = vector.broadcast %121 : vector<1x128xf32> to vector<32x128xf32>
    %123 = arith.mulf %120, %122 : vector<32x128xf32>
    %124 = arith.truncf %123 : vector<32x128xf32> to vector<32x128xbf16>
    %c224_71 = arith.constant 224 : index
    %c0_72 = arith.constant 0 : index
    %125 = vector.load %arg11[%c224_71, %c0_72] : memref<288x128xbf16, #tpu.memory_space<vmem>>, vector<32x128xbf16>
    tpu.vector_store %arg11[%c224_71, %c0_72], %124 {strides = array<i32>} : memref<288x128xbf16, #tpu.memory_space<vmem>>, vector<32x128xbf16>,
    %c119_i32_73 = arith.constant 119 : i32
    %126 = tpu.dynamic_rotate %81 by %c119_i32_73 dim 1 : vector<32x128xf32>, i32 -> vector<32x128xf32>
    %c8_74 = arith.constant 8 : index
    %c0_75 = arith.constant 0 : index
    %127 = vector.load %arg1[%c8_74, %c0_75] : memref<9x128xf32, #tpu.memory_space<vmem>>, vector<1x128xf32>
    %128 = vector.broadcast %127 : vector<1x128xf32> to vector<32x128xf32>
    %129 = arith.mulf %126, %128 : vector<32x128xf32>
    %130 = arith.truncf %129 : vector<32x128xf32> to vector<32x128xbf16>
    %c256_76 = arith.constant 256 : index
    %c0_77 = arith.constant 0 : index
    %131 = vector.load %arg11[%c256_76, %c0_77] : memref<288x128xbf16, #tpu.memory_space<vmem>>, vector<32x128xbf16>
    tpu.vector_store %arg11[%c256_76, %c0_77], %130 {strides = array<i32>} : memref<288x128xbf16, #tpu.memory_space<vmem>>, vector<32x128xbf16>,
    %c0_78 = arith.constant 0 : index
    %c0_79 = arith.constant 0 : index
    %132 = vector.load %arg6[%c0_78, %c0_79] : memref<32x288xbf16, #tpu.memory_space<vmem>>, vector<32x288xbf16>
    %c0_80 = arith.constant 0 : index
    %c0_81 = arith.constant 0 : index
    %133 = vector.load %arg11[%c0_80, %c0_81] : memref<288x128xbf16, #tpu.memory_space<vmem>>, vector<288x128xbf16>
    %cst_82 = arith.constant dense<0.000000e+00> : vector<32x128xf32>
    %134 = tpu.matmul %132, %133, %cst_82 {dimension_numbers = #tpu.dot_dimension_numbers<[1], [0], [0], [1], [0, 0, 1, 1], [], []>} : vector<32x288xbf16>, vector<288x128xbf16>, vector<32x128xf32> -> vector<32x128xf32>
    %c0_83 = arith.constant 0 : index
    %c0_84 = arith.constant 0 : index
    %135 = vector.load %arg7[%c0_83, %c0_84] : memref<32x1xf32, #tpu.memory_space<vmem>>, vector<32x1xf32>
    %136 = vector.broadcast %135 : vector<32x1xf32> to vector<32x128xf32>
    %137 = arith.addf %134, %136 : vector<32x128xf32>
    %cst_85 = arith.constant 0.000000e+00 : f32
    %138 = vector.broadcast %cst_85 : f32 to vector<32x128xf32>
    %139 = arith.maximumf %137, %138 : vector<32x128xf32>
    %140 = arith.addf %139, %0 : vector<32x128xf32>
    %c0_86 = arith.constant 0 : index
    %c0_87 = arith.constant 0 : index
    %141 = vector.load %arg8[%c0_86, %c0_87] : memref<32x1xf32, #tpu.memory_space<vmem>>, vector<32x1xf32>
    %c0_88 = arith.constant 0 : index
    %c0_89 = arith.constant 0 : index
    %142 = vector.load %arg9[%c0_88, %c0_89] : memref<32x1xf32, #tpu.memory_space<vmem>>, vector<32x1xf32>
    %cst_90 = arith.constant dense<0.000000e+00> : vector<32xf32>
    %143 = vector.multi_reduction <add>, %140, %cst_90 [1] : vector<32x128xf32> to vector<32xf32>
    %144 = vector.shape_cast %143 : vector<32xf32> to vector<32x1xf32>
    %cst_91 = arith.constant 7.812500e-03 : f32
    %145 = vector.broadcast %cst_91 : f32 to vector<32x1xf32>
    %146 = arith.mulf %144, %145 : vector<32x1xf32>
    %147 = arith.mulf %140, %140 : vector<32x128xf32>
    %cst_92 = arith.constant dense<0.000000e+00> : vector<32xf32>
    %148 = vector.multi_reduction <add>, %147, %cst_92 [1] : vector<32x128xf32> to vector<32xf32>
    %149 = vector.shape_cast %148 : vector<32xf32> to vector<32x1xf32>
    %cst_93 = arith.constant 7.812500e-03 : f32
    %150 = vector.broadcast %cst_93 : f32 to vector<32x1xf32>
    %151 = arith.mulf %149, %150 : vector<32x1xf32>
    %152 = arith.mulf %146, %146 : vector<32x1xf32>
    %153 = arith.subf %151, %152 : vector<32x1xf32>
    %cst_94 = arith.constant 9.99999974E-6 : f32
    %154 = vector.broadcast %cst_94 : f32 to vector<32x1xf32>
    %155 = arith.addf %153, %154 : vector<32x1xf32>
    %156 = math.rsqrt %155 : vector<32x1xf32>
    %157 = arith.mulf %141, %156 : vector<32x1xf32>
    %158 = arith.mulf %146, %157 : vector<32x1xf32>
    %159 = arith.subf %142, %158 : vector<32x1xf32>
    %160 = vector.broadcast %157 : vector<32x1xf32> to vector<32x128xf32>
    %161 = arith.mulf %140, %160 : vector<32x128xf32>
    %162 = vector.broadcast %159 : vector<32x1xf32> to vector<32x128xf32>
    %163 = arith.addf %161, %162 : vector<32x128xf32>
    %c0_95 = arith.constant 0 : index
    %c0_96 = arith.constant 0 : index
    %164 = vector.load %arg10[%c0_95, %c0_96] : memref<32x128xf32, #tpu.memory_space<vmem>>, vector<32x128xf32>
    tpu.vector_store %arg10[%c0_95, %c0_96], %163 {strides = array<i32>} : memref<32x128xf32, #tpu.memory_space<vmem>>, vector<32x128xf32>,
    return
  }
}

</mosaic_0001>

<bundles_post_ra>
// kernel: resblock1_pallas.1
= control target key start
LH: loop header
LB: loop body
LE: loop exit
PB: predicated region body
PF: predicated region fallthrough
CT: control target
= control target key end

     0   :  { %s1154_s17 = smov 9   ;;  %s1155_s22 = smov 127   ;;  %vm292_vm0 = vcmask 261120   ;;  %v1162_v7 = vmov 0   ;;  %s1622_s0 = inlined_call_operand.vmem [shape: f32[32,128], index: 0, kind: input, shape index: {}]   ;;  %s1623_s2 = inlined_call_operand.vmem [shape: bf16[32,288], index: 2, kind: input, shape index: {}]   ;;  %s1624_s3 = inlined_call_operand.vmem [shape: f32[32,1], index: 3, kind: input, shape index: {}]   ;;  %s1625_s1 = inlined_call_operand.vmem [shape: f32[9,128], index: 1, kind: input, shape index: {}]   ;;  %s1626_s4 = inlined_call_operand.vmem [shape: f32[32,1], index: 4, kind: input, shape index: {}]   ;;  %s1627_s5 = inlined_call_operand.vmem [shape: f32[32,1], index: 5, kind: input, shape index: {}]   ;;  %s1628_s6 = inlined_call_operand.vmem [shape: bf16[32,288], index: 6, kind: input, shape index: {}]   ;;  %s1629_s7 = inlined_call_operand.vmem [shape: f32[32,1], index: 7, kind: input, shape index: {}]   ;;  %s1630_s8 = inlined_call_operand.vmem [shape: f32[32,1], index: 8, kind: input, shape index: {}]   ;;  %s1631_s9 = inlined_call_operand.vmem [shape: f32[32,1], index: 9, kind: input, shape index: {}]   ;;  %s1632_s10 = inlined_call_operand.vmem [shape: f32[32,128], index: 10, kind: output, shape index: {}]  }
   0x1   :  { %v1221_v0 = vld [vmem:[%s1622_s0 + $0x10] sm:$0xff]  ;;  %v1226_v1 = vld [vmem:[%s1622_s0] sm:$0xff]  ;;  %v1235_v2 = vld [vmem:[%s1622_s0 + $0x8] sm:$0xff]  ;;  %s1156_s23 = smov 8   ;;  %s1157_s24 = smov 121   ;;  %1119 = vset.pattern.permute.xlu1 %v1162_v7  ;;  %1118 = vset.pattern.permute.xlu0 %v1162_v7 }
   0x2   :  { %44 = vrot.lane.b32.xlu1 %v1221_v0, %s1154_s17  ;;  %40 = vrot.lane.b32.xlu0 %v1226_v1, %s1154_s17  ;;  %v1240_v3 = vld [vmem:[%s1622_s0 + $0x18] sm:$0xff]  ;;  %v124_v4 = vpack.c.bf16 %v1235_v2, %v1226_v1  ;;  %s1158_s25 = smov 7   ;;  %s1159_s26 = smov 120   ;;  %v1122_v5 = vld [vmem:[%s1623_s2 + $0x4] ss:$12 sps:$4 sm:$0xff]  }
   0x3   :  { %s1160_s27 = smov 1   ;;  %331 = vmatprep.mubr.bf16.mxu0 %v1122_v5  ;;  %v1126_v6 = vld [vmem:[%s1623_s2 + $0x8] ss:$12 sps:$4 sm:$0xff]   ;;  %s1161_s12 = smov 119   ;;  %v238_v9 = vld [vmem:[%s1624_s3] sm:$0xff]  ;;  %v241_v11 = vld [vmem:[%s1624_s3 + $0x18] sm:$0xff]  ;;  %v125_v20 = vpack.c.bf16 %v1240_v3, %v1221_v0 }
   0x4   :  { %1029 = vmatprep.subr.bf16.mxu0 %v124_v4  ;;  %1097 = vmatprep.mubr.msk.bf16.mxu1 %vm292_vm0, %v1126_v6  ;;  %v239_v8 = vld [vmem:[%s1624_s3 + $0x8] sm:$0xff]  ;;  %v240_v10 = vld [vmem:[%s1624_s3 + $0x10] sm:$0xff]  ;;  %v1326_v14 = vld [vmem:[%s1625_s1] ss:$0 sm:$0xff] }
   0x5   :  { %v1333_v19 = vld [vmem:[%s1625_s1 + $0x5] ss:$0 sm:$0xff]  ;;  %v1344_v28 = vld [vmem:[%s1625_s1 + $0x1] ss:$0 sm:$0xff]  ;;  %v1355_v45 = vld [vmem:[%s1625_s1 + $0x6] ss:$0 sm:$0xff] }
   0x6   :  { %46 = vrot.lane.b32.xlu1 %v1240_v3, %s1154_s17  ;;  %42 = vrot.lane.b32.xlu0 %v1235_v2, %s1154_s17  ;;  %v1362_v51 = vld [vmem:[%s1625_s1 + $0x2] ss:$0 sm:$0xff]  ;;  %v1373_v5 = vld [vmem:[%s1625_s1 + $0x7] ss:$0 sm:$0xff] }
   0xa   :  { %130 = vrot.lane.b32.xlu1 %v1235_v2, %s1155_s22  ;;  %128 = vrot.lane.b32.xlu0 %v1226_v1, %s1155_s22 }
   0xe   :  { %63 = vrot.lane.b32.xlu1 %v1235_v2, %s1156_s23  ;;  %61 = vrot.lane.b32.xlu0 %v1226_v1, %s1156_s23 }
  0x12   :  { %134 = vrot.lane.b32.xlu1 %v1240_v3, %s1155_s22  ;;  %132 = vrot.lane.b32.xlu0 %v1221_v0, %s1155_s22 }
  0x16   :  { %67 = vrot.lane.b32.xlu1 %v1240_v3, %s1156_s23  ;;  %65 = vrot.lane.b32.xlu0 %v1221_v0, %s1156_s23 }
  0x1a   :  { %151 = vrot.lane.b32.xlu1 %v1235_v2, %s1157_s24  ;;  %149 = vrot.lane.b32.xlu0 %v1226_v1, %s1157_s24 }
  0x1e   :  { %84 = vrot.lane.b32.xlu1 %v1235_v2, %s1158_s25  ;;  %82 = vrot.lane.b32.xlu0 %v1226_v1, %s1158_s25 }
  0x22   :  { %155 = vrot.lane.b32.xlu1 %v1240_v3, %s1157_s24  ;;  %153 = vrot.lane.b32.xlu0 %v1221_v0, %s1157_s24 }
  0x26   :  { %88 = vrot.lane.b32.xlu1 %v1240_v3, %s1158_s25  ;;  %86 = vrot.lane.b32.xlu0 %v1221_v0, %s1158_s25 }
  0x2a   :  { %172 = vrot.lane.b32.xlu1 %v1235_v2, %s1159_s26  ;;  %170 = vrot.lane.b32.xlu0 %v1226_v1, %s1159_s26 }
  0x2e   :  { %105 = vrot.lane.b32.xlu1 %v1235_v2, %s1160_s27  ;;  %103 = vrot.lane.b32.xlu0 %v1226_v1, %s1160_s27 }
  0x32   :  { %176 = vrot.lane.b32.xlu1 %v1240_v3, %s1159_s26  ;;  %174 = vrot.lane.b32.xlu0 %v1221_v0, %s1159_s26 }
  0x36   :  { %109 = vrot.lane.b32.xlu1 %v1240_v3, %s1160_s27  ;;  %107 = vrot.lane.b32.xlu0 %v1221_v0, %s1160_s27 }
  0x3a   :  { %193 = vrot.lane.b32.xlu1 %v1235_v2, %s1161_s12  ;;  %191 = vrot.lane.b32.xlu0 %v1226_v1, %s1161_s12 }
  0x3e   :  { %197 = vrot.lane.b32.xlu1 %v1240_v3, %s1161_s12  ;;  %195 = vrot.lane.b32.xlu0 %v1221_v0, %s1161_s12 }
  0x42   :  { %249 = vperm.xlu1 %1119, %v239_v8   ;;  %244 = vperm.xlu0 %1118, %v238_v9  }
  0x46   :  { %254 = vperm.xlu1 %1119, %v240_v10   ;;  %259 = vperm.xlu0 %1118, %v241_v11   ;;  %v1380_v11 = vld [vmem:[%s1625_s1 + $0x3] ss:$0 sm:$0xff] }
  0x74   :  { %v45_v12 = vpop.permute.xlu1 %44  ;;  %v41_v13 = vpop.permute.xlu0 %40 }
  0x75   :  { %v53_v17 = vmul.f32 %v1326_v14, %v41_v13  ;;  %v55_v25 = vmul.f32 %v1326_v14, %v45_v12 }
  0x78   :  { %v47_v15 = vpop.permute.xlu1 %46  ;;  %v43_v16 = vpop.permute.xlu0 %42 }
  0x79   :  { %v54_v18 = vmul.f32 %v1326_v14, %v43_v16  ;;  %v56_v21 = vmul.f32 %v1326_v14, %v47_v15 }
  0x7b   :  { %v57_v22 = vpack.c.bf16 %v54_v18, %v53_v17  ;;  %v58_v29 = vpack.c.bf16 %v56_v21, %v55_v25 }
  0x7c   :  { %v131_v23 = vpop.permute.xlu1 %130  ;;  %v129_v24 = vpop.permute.xlu0 %128 }
  0x7d   :  { %v142_v26 = vmul.f32 %v1333_v19, %v131_v23  ;;  %v141_v27 = vmul.f32 %v1333_v19, %v129_v24  ;;  %1030 = vmatpush3.bf16.msra.mxu0 %v57_v22 }
  0x7e   :  { %1031 = vmatprep.subr.bf16.mxu0 %v125_v20 }
  0x7f   :  { %v145_v30 = vpack.c.bf16 %v142_v26, %v141_v27 }
  0x80   :  { %v64_v31 = vpop.permute.xlu1 %63  ;;  %v62_v32 = vpop.permute.xlu0 %61 }
  0x81   :  { %v75_v33 = vmul.f32 %v1344_v28, %v64_v31  ;;  %v74_v34 = vmul.f32 %v1344_v28, %v62_v32  ;;  %1032 = vmatpush3.bf16.msra.mxu0 %v58_v29 }
  0x82   :  { %1033 = vmatprep.subr.bf16.mxu0 %v145_v30  ;;  %v1391_v30 = vld [vmem:[%s1625_s1 + $0x8] ss:$0 sm:$0xff] }
  0x83   :  { %v78_v35 = vpack.c.bf16 %v75_v33, %v74_v34  ;;  %v1120_v34 = vld [vmem:[%s1623_s2] ss:$12 sps:$4 sm:$0xff]  }
  0x84   :  { %v135_v36 = vpop.permute.xlu1 %134  ;;  %v133_v37 = vpop.permute.xlu0 %132 }
  0x85   :  { %v144_v38 = vmul.f32 %v1333_v19, %v135_v36  ;;  %v143_v39 = vmul.f32 %v1333_v19, %v133_v37  ;;  %1034 = vmatpush3.bf16.msra.mxu0 %v78_v35  ;;  %v1123_v37 = vld [vmem:[%s1623_s2 + $0x1c] ss:$12 sps:$4 sm:$0xff]  }
  0x87   :  { %v146_v40 = vpack.c.bf16 %v144_v38, %v143_v39 }
  0x88   :  { %v68_v41 = vpop.permute.xlu1 %67  ;;  %v66_v42 = vpop.permute.xlu0 %65 }
  0x89   :  { %v77_v43 = vmul.f32 %v1344_v28, %v68_v41  ;;  %v76_v44 = vmul.f32 %v1344_v28, %v66_v42  ;;  %1035 = vmatprep.subr.bf16.mxu0 %v146_v40 }
  0x8b   :  { %v79_v46 = vpack.c.bf16 %v77_v43, %v76_v44  ;;  %v1125_v44 = vld [vmem:[%s1623_s2 + $0x18] ss:$12 sps:$4 sm:$0xff]  }
  0x8c   :  { %v152_v47 = vpop.permute.xlu1 %151  ;;  %v150_v48 = vpop.permute.xlu0 %149 }
  0x8d   :  { %v163_v49 = vmul.f32 %v1355_v45, %v152_v47  ;;  %v162_v50 = vmul.f32 %v1355_v45, %v150_v48  ;;  %1036 = vmatpush3.bf16.msra.mxu0 %v79_v46  ;;  %v1127_v46 = vld [vmem:[%s1623_s2 + $0x20] ss:$12 sps:$4 sm:$0xff]  }
  0x8f   :  { %v166_v52 = vpack.c.bf16 %v163_v49, %v162_v50 }
  0x90   :  { %v85_v53 = vpop.permute.xlu1 %84  ;;  %v83_v54 = vpop.permute.xlu0 %82 }
  0x91   :  { %v96_v55 = vmul.f32 %v1362_v51, %v85_v53  ;;  %v95_v56 = vmul.f32 %v1362_v51, %v83_v54  ;;  %1037 = vmatprep.subr.bf16.mxu0 %v166_v52 }
  0x93   :  { %v99_v57 = vpack.c.bf16 %v96_v55, %v95_v56 }
  0x94   :  { %v156_v58 = vpop.permute.xlu1 %155  ;;  %v154_v59 = vpop.permute.xlu0 %153 }
  0x95   :  { %v165_v60 = vmul.f32 %v1355_v45, %v156_v58  ;;  %v164_v61 = vmul.f32 %v1355_v45, %v154_v59  ;;  %1038 = vmatpush3.bf16.msra.mxu0 %v99_v57 }
  0x97   :  { %v167_v62 = vpack.c.bf16 %v165_v60, %v164_v61 }
  0x98   :  { %v89_v63 = vpop.permute.xlu1 %88  ;;  %v87_v0 = vpop.permute.xlu0 %86 }
  0x99   :  { %v98_v3 = vmul.f32 %v1362_v51, %v89_v63  ;;  %v97_v4 = vmul.f32 %v1362_v51, %v87_v0  ;;  %1039 = vmatprep.subr.bf16.mxu0 %v167_v62 }
  0x9b   :  { %v100_v6 = vpack.c.bf16 %v98_v3, %v97_v4 }
  0x9c   :  { %v173_v7 = vpop.permute.xlu1 %172  ;;  %v171_v8 = vpop.permute.xlu0 %170 }
  0x9d   :  { %v184_v9 = vmul.f32 %v1373_v5, %v173_v7  ;;  %v183_v10 = vmul.f32 %v1373_v5, %v171_v8  ;;  %1040 = vmatpush3.bf16.msra.mxu0 %v100_v6 }
  0x9f   :  { %v187_v12 = vpack.c.bf16 %v184_v9, %v183_v10 }
  0xa0   :  { %v106_v13 = vpop.permute.xlu1 %105  ;;  %v104_v15 = vpop.permute.xlu0 %103 }
  0xa1   :  { %v117_v16 = vmul.f32 %v1380_v11, %v106_v13  ;;  %v116_v17 = vmul.f32 %v1380_v11, %v104_v15  ;;  %1041 = vmatprep.subr.bf16.mxu0 %v187_v12 }
  0xa3   :  { %v120_v18 = vpack.c.bf16 %v117_v16, %v116_v17 }
  0xa4   :  { %v177_v20 = vpop.permute.xlu1 %176  ;;  %v175_v21 = vpop.permute.xlu0 %174 }
  0xa5   :  { %v186_v22 = vmul.f32 %v1373_v5, %v177_v20  ;;  %v185_v23 = vmul.f32 %v1373_v5, %v175_v21  ;;  %1042 = vmatpush3.bf16.msra.mxu0 %v120_v18 }
  0xa7   :  { %v188_v24 = vpack.c.bf16 %v186_v22, %v185_v23 }
  0xa8   :  { %v110_v25 = vpop.permute.xlu1 %109  ;;  %v108_v26 = vpop.permute.xlu0 %107 }
  0xa9   :  { %v119_v27 = vmul.f32 %v1380_v11, %v110_v25  ;;  %v118_v29 = vmul.f32 %v1380_v11, %v108_v26  ;;  %1043 = vmatprep.subr.bf16.mxu0 %v188_v24 }
  0xab   :  { %v121_v31 = vpack.c.bf16 %v119_v27, %v118_v29 }
  0xac   :  { %v194_v32 = vpop.permute.xlu1 %193  ;;  %v192_v33 = vpop.permute.xlu0 %191 }
  0xad   :  { %v205_v35 = vmul.f32 %v1391_v30, %v194_v32  ;;  %v204_v36 = vmul.f32 %v1391_v30, %v192_v33  ;;  %1044 = vmatpush3.bf16.msra.mxu0 %v121_v31 }
  0xaf   :  { %v208_v38 = vpack.c.bf16 %v205_v35, %v204_v36 }
  0xb0   :  { %v198_v39 = vpop.permute.xlu1 %197  ;;  %v196_v40 = vpop.permute.xlu0 %195  ;;  %332 = vmatmul.mubr.bf16.vlgmr.msra.gmra.mrb[0].mxu0 %v1120_v34 }
  0xb1   :  { %v207_v41 = vmul.f32 %v1391_v30, %v198_v39  ;;  %v206_v42 = vmul.f32 %v1391_v30, %v196_v40  ;;  %1093 = vmatprep.subr.bf16.mxu1 %v208_v38  ;;  %339 = vmatprep.mubr.bf16.mxu0 %v1123_v37 }
  0xb2   :  { %1094 = vmatpush3.bf16.msra.mxu1 %v208_v38 }
  0xb3   :  { %v209_v43 = vpack.c.bf16 %v207_v41, %v206_v42 }
  0xb5   :  { %1095 = vmatprep.subr.bf16.mxu1 %v209_v43 }
  0xb6   :  { %1096 = vmatpush3.bf16.msra.mxu1 %v209_v43 }
  0xb8   :  { %340 = vmatmul.mubr.bf16.gmra.mrb[4].mxu0 %v1125_v44 }
  0xb9   :  { %1098 = vmatmul.mubr.msk.bf16.vlgmr.msra.gmra.mrb[0].mxu1 %vm292_vm0, %v1127_v46 }
  0xc1   :  { %v250_v52 = vpop.permute.xlu1 %249  ;;  %v245_v55 = vpop.permute.xlu0 %244 }
  0xc5   :  { %v255_v58 = vpop.permute.xlu1 %254  ;;  %v260_v12 = vpop.permute.xlu0 %259 }
 0x183   :  { %v1045_v47 = vpop.f32.mrb[0].mxu0 }
 0x184   :  { %v1046_v48 = vpop.f32.mrb[1].mxu0 }
 0x185   :  { %v1047_v49 = vadd.f32 %v1046_v48, %v1045_v47  ;;  %v1048_v50 = vpop.f32.mrb[2].mxu0 }
 0x186   :  { %v1049_v53 = vpop.f32.mrb[3].mxu0 }
 0x187   :  { %v1050_v54 = vadd.f32 %v1049_v53, %v1048_v50  ;;  %v334_v56 = vadd.f32 %v1047_v49, %v245_v55 }
 0x189   :  { %v337_v0 = vadd.f32 %v1050_v54, %v250_v52 }
 0x18b   :  { %v1051_v57 = vpop.f32.mrb[4].mxu0 }
 0x18c   :  { %v1052_v59 = vpop.f32.mrb[5].mxu0  ;;  %v1099_v60 = vpop.f32.mrb[0].mxu1 }
 0x18d   :  { %v1053_v61 = vadd.f32 %v1052_v59, %v1051_v57  ;;  %v382_v62 = vpop.f32.mrb[1].mxu1  ;;  %v1054_v63 = vpop.f32.mrb[6].mxu0 }
 0x18e   :  { %v383_v3 = vadd.f32 %v382_v62, %v334_v56  ;;  %v1055_v4 = vpop.f32.mrb[7].mxu0  ;;  %v1100_v6 = vpop.f32.mrb[2].mxu1 }
 0x18f   :  { %v342_v7 = vadd.f32 %v1053_v61, %v255_v58  ;;  %v1056_v8 = vadd.f32 %v1055_v4, %v1054_v63  ;;  %v385_v9 = vpop.f32.mrb[3].mxu1  ;;  %v402_v58 = vld [vmem:[%s1626_s4 + $0x8] sm:$0xff]  ;;  %v405_v4 = vld [vmem:[%s1627_s5] sm:$0xff] }
 0x190   :  { %v1410_v10 = vmax.f32 %v383_v3, 0.0  ;;  %v386_v13 = vadd.f32 %v385_v9, %v337_v0  ;;  %v406_v3 = vld [vmem:[%s1627_s5 + $0x8] sm:$0xff] }
 0x191   :  { %v391_v15 = vadd.f32 %v1099_v60, %v342_v7  ;;  %v345_v16 = vadd.f32 %v1056_v8, %v260_v12  ;;  %v401_v60 = vld [vmem:[%s1626_s4] sm:$0xff]  ;;  %v404_v7 = vld [vmem:[%s1626_s4 + $0x18] sm:$0xff] }
 0x192   :  { %v1412_v17 = vmax.f32 %v386_v13, 0.0  ;;  %409 = vadd.xlane.f32.xlu1 %v1410_v10  ;;  %v421_v21 = vmul.f32 %v1410_v10, %v1410_v10  ;;  %v403_v13 = vld [vmem:[%s1626_s4 + $0x10] sm:$0xff] }
 0x193   :  { %v394_v18 = vadd.f32 %v1100_v6, %v345_v16  ;;  %v1422_v23 = vmax.f32 %v391_v15, 0.0 }
 0x194   :  { %411 = vadd.xlane.f32.xlu0 %v1412_v17  ;;  %v422_v20 = vmul.f32 %v1412_v17, %v1412_v17 }
 0x195   :  { %v1420_v22 = vmax.f32 %v394_v18, 0.0  ;;  %v423_v25 = vmul.f32 %v1422_v23, %v1422_v23 }
 0x196   :  { %427 = vadd.xlane.f32.xlu1 %v422_v20 }
 0x197   :  { %v424_v24 = vmul.f32 %v1420_v22, %v1420_v22 }
 0x198   :  { %425 = vadd.xlane.f32.xlu0 %v421_v21  ;;  %v408_v21 = vld [vmem:[%s1627_s5 + $0x18] sm:$0xff] }
 0x19a   :  { %415 = vadd.xlane.f32.xlu1 %v1420_v22 }
 0x19c   :  { %413 = vadd.xlane.f32.xlu0 %v1422_v23 }
 0x19e   :  { %431 = vadd.xlane.f32.xlu1 %v424_v24  ;;  %v407_v24 = vld [vmem:[%s1627_s5 + $0x10] sm:$0xff] }
 0x1a0   :  { %429 = vadd.xlane.f32.xlu0 %v423_v25 }
 0x21f   :  { %v410_v26 = vpop.xlane.xlu1 %409 }
 0x220   :  { %v417_v29 = vmul.f32 0.0078125, %v410_v26 }
 0x221   :  { %v412_v27 = vpop.xlane.xlu0 %411 }
 0x222   :  { %v418_v31 = vmul.f32 0.0078125, %v412_v27  ;;  %v437_v36 = vmul.f32 %v417_v29, %v417_v29 }
 0x223   :  { %v428_v32 = vpop.xlane.xlu1 %427 }
 0x224   :  { %v438_v33 = vmul.f32 %v418_v31, %v418_v31  ;;  %v434_v34 = vmul.f32 0.0078125, %v428_v32 }
 0x225   :  { %v426_v35 = vpop.xlane.xlu0 %425 }
 0x226   :  { %v442_v37 = vsub.f32 %v434_v34, %v438_v33  ;;  %v433_v38 = vmul.f32 0.0078125, %v426_v35 }
 0x227   :  { %v416_v39 = vpop.xlane.xlu1 %415 }
 0x228   :  { %v446_v40 = vadd.f32 1e-05, %v442_v37  ;;  %v441_v41 = vsub.f32 %v433_v38, %v437_v36  ;;  %v420_v42 = vmul.f32 0.0078125, %v416_v39 }
 0x229   :  { %v414_v43 = vpop.xlane.xlu0 %413 }
 0x22a   :  { %1136 = vrsqrt.f32 %v446_v40  ;;  %v445_v44 = vadd.f32 1e-05, %v441_v41  ;;  %v419_v46 = vmul.f32 0.0078125, %v414_v43  ;;  %v440_v48 = vmul.f32 %v420_v42, %v420_v42 }
 0x22b   :  { %v432_v47 = vpop.xlane.xlu1 %431 }
 0x22c   :  { %1138 = vrsqrt.f32 %v445_v44  ;;  %v436_v49 = vmul.f32 0.0078125, %v432_v47  ;;  %v439_v52 = vmul.f32 %v419_v46, %v419_v46  ;;  %v711_v47 = vld [vmem:[%s1629_s7] sm:$0xff] }
 0x22d   :  { %v430_v50 = vpop.xlane.xlu0 %429 }
 0x22e   :  { %v444_v53 = vsub.f32 %v436_v49, %v440_v48  ;;  %v435_v54 = vmul.f32 0.0078125, %v430_v50  ;;  %v712_v48 = vld [vmem:[%s1629_s7 + $0x8] sm:$0xff]  ;;  %v713_v49 = vld [vmem:[%s1629_s7 + $0x10] sm:$0xff]  ;;  %v714_v50 = vld [vmem:[%s1629_s7 + $0x18] sm:$0xff] }
 0x230   :  { %v448_v55 = vadd.f32 1e-05, %v444_v53  ;;  %v443_v56 = vsub.f32 %v435_v54, %v439_v52 }
 0x232   :  { %1140 = vrsqrt.f32 %v448_v55  ;;  %v447_v57 = vadd.f32 1e-05, %v443_v56 }
 0x234   :  { %v1137_v59 = vpop.eup %1136  ;;  %1142 = vrsqrt.f32 %v447_v57 }
 0x235   :  { %v454_v61 = vmul.f32 %v1137_v59, %v402_v58 }
 0x236   :  { %v1139_v62 = vpop.eup %1138 }
 0x237   :  { %472 = vperm.xlu1 %1119, %v454_v61   ;;  %v453_v63 = vmul.f32 %v1139_v62, %v401_v60  ;;  %v458_v0 = vmul.f32 %v454_v61, %v418_v31 }
 0x239   :  { %467 = vperm.xlu0 %1118, %v453_v63   ;;  %v457_v6 = vmul.f32 %v453_v63, %v417_v29  ;;  %v462_v8 = vsub.f32 %v406_v3, %v458_v0 }
 0x23b   :  { %v461_v9 = vsub.f32 %v405_v4, %v457_v6 }
 0x23c   :  { %v1141_v12 = vpop.eup %1140 }
 0x23d   :  { %496 = vperm.xlu0 %1118, %v462_v8   ;;  %491 = vperm.xlu1 %1119, %v461_v9   ;;  %v456_v15 = vmul.f32 %v1141_v12, %v404_v7 }
 0x23e   :  { %v1143_v16 = vpop.eup %1142 }
 0x23f   :  { %v455_v18 = vmul.f32 %v1143_v16, %v403_v13  ;;  %v460_v20 = vmul.f32 %v456_v15, %v420_v42 }
 0x241   :  { %482 = vperm.xlu0 %1118, %v456_v15   ;;  %477 = vperm.xlu1 %1119, %v455_v18   ;;  %v459_v25 = vmul.f32 %v455_v18, %v419_v46  ;;  %v464_v26 = vsub.f32 %v408_v21, %v460_v20 }
 0x243   :  { %v463_v27 = vsub.f32 %v407_v24, %v459_v25 }
 0x245   :  { %506 = vperm.xlu0 %1118, %v464_v26   ;;  %501 = vperm.xlu1 %1119, %v463_v27  }
 0x2b6   :  { %v473_v29 = vpop.permute.xlu1 %472 }
 0x2b7   :  { %v486_v32 = vmul.f32 %v473_v29, %v1412_v17 }
 0x2b8   :  { %v468_v31 = vpop.permute.xlu0 %467 }
 0x2b9   :  { %v485_v33 = vmul.f32 %v468_v31, %v1410_v10 }
 0x2bc   :  { %v492_v34 = vpop.permute.xlu1 %491  ;;  %v497_v35 = vpop.permute.xlu0 %496 }
 0x2bd   :  { %v509_v36 = vadd.f32 %v492_v34, %v485_v33  ;;  %v510_v37 = vadd.f32 %v497_v35, %v486_v32 }
 0x2bf   :  { %513 = vrot.lane.b32.xlu1 %v509_v36, %s1154_s17  ;;  %515 = vrot.lane.b32.xlu0 %v510_v37, %s1154_s17  ;;  %v597_v38 = vpack.c.bf16 %v510_v37, %v509_v36 }
 0x2c0   :  { %v478_v39 = vpop.permute.xlu1 %477  ;;  %v483_v40 = vpop.permute.xlu0 %482 }
 0x2c1   :  { %1061 = vmatprep.subr.bf16.mxu1 %v597_v38  ;;  %v487_v41 = vmul.f32 %v478_v39, %v1422_v23  ;;  %v488_v42 = vmul.f32 %v483_v40, %v1420_v22  ;;  %v1130_v22 = vld [vmem:[%s1628_s6 + $0x4] ss:$12 sps:$4 sm:$0xff]   ;;  %v1134_v23 = vld [vmem:[%s1628_s6 + $0x8] ss:$12 sps:$4 sm:$0xff]  }
 0x2c2   :  { %803 = vmatprep.mubr.bf16.mxu1 %v1130_v22  ;;  %1105 = vmatprep.mubr.msk.bf16.mxu0 %vm292_vm0, %v1134_v23 }
 0x2c3   :  { %601 = vrot.lane.b32.xlu1 %v509_v36, %s1155_s22  ;;  %603 = vrot.lane.b32.xlu0 %v510_v37, %s1155_s22 }
 0x2c4   :  { %v502_v10 = vpop.permute.xlu1 %501  ;;  %v507_v17 = vpop.permute.xlu0 %506 }
 0x2c5   :  { %v511_v43 = vadd.f32 %v502_v10, %v487_v41  ;;  %v512_v44 = vadd.f32 %v507_v17, %v488_v42 }
 0x2c7   :  { %534 = vrot.lane.b32.xlu1 %v509_v36, %s1156_s23  ;;  %536 = vrot.lane.b32.xlu0 %v510_v37, %s1156_s23  ;;  %v598_v46 = vpack.c.bf16 %v512_v44, %v511_v43 }
 0x2cb   :  { %622 = vrot.lane.b32.xlu1 %v509_v36, %s1157_s24  ;;  %624 = vrot.lane.b32.xlu0 %v510_v37, %s1157_s24 }
 0x2cf   :  { %555 = vrot.lane.b32.xlu1 %v509_v36, %s1158_s25  ;;  %557 = vrot.lane.b32.xlu0 %v510_v37, %s1158_s25 }
 0x2d3   :  { %643 = vrot.lane.b32.xlu1 %v509_v36, %s1159_s26  ;;  %645 = vrot.lane.b32.xlu0 %v510_v37, %s1159_s26 }
 0x2d7   :  { %576 = vrot.lane.b32.xlu1 %v509_v36, %s1160_s27  ;;  %578 = vrot.lane.b32.xlu0 %v510_v37, %s1160_s27 }
 0x2db   :  { %517 = vrot.lane.b32.xlu1 %v511_v43, %s1154_s17  ;;  %519 = vrot.lane.b32.xlu0 %v512_v44, %s1154_s17 }
 0x2df   :  { %605 = vrot.lane.b32.xlu1 %v511_v43, %s1155_s22  ;;  %607 = vrot.lane.b32.xlu0 %v512_v44, %s1155_s22 }
 0x2e3   :  { %538 = vrot.lane.b32.xlu1 %v511_v43, %s1156_s23  ;;  %540 = vrot.lane.b32.xlu0 %v512_v44, %s1156_s23 }
 0x2e7   :  { %626 = vrot.lane.b32.xlu1 %v511_v43, %s1157_s24  ;;  %628 = vrot.lane.b32.xlu0 %v512_v44, %s1157_s24 }
 0x2eb   :  { %559 = vrot.lane.b32.xlu1 %v511_v43, %s1158_s25  ;;  %561 = vrot.lane.b32.xlu0 %v512_v44, %s1158_s25 }
 0x2ef   :  { %647 = vrot.lane.b32.xlu1 %v511_v43, %s1159_s26  ;;  %649 = vrot.lane.b32.xlu0 %v512_v44, %s1159_s26 }
 0x2f3   :  { %580 = vrot.lane.b32.xlu1 %v511_v43, %s1160_s27  ;;  %582 = vrot.lane.b32.xlu0 %v512_v44, %s1160_s27 }
 0x2f7   :  { %664 = vrot.lane.b32.xlu1 %v509_v36, %s1161_s12  ;;  %666 = vrot.lane.b32.xlu0 %v510_v37, %s1161_s12 }
 0x2fb   :  { %668 = vrot.lane.b32.xlu1 %v511_v43, %s1161_s12  ;;  %670 = vrot.lane.b32.xlu0 %v512_v44, %s1161_s12 }
 0x2ff   :  { %717 = vperm.xlu1 %1119, %v711_v47   ;;  %722 = vperm.xlu0 %1118, %v712_v48  }
 0x303   :  { %727 = vperm.xlu1 %1119, %v713_v49   ;;  %732 = vperm.xlu0 %1118, %v714_v50  }
 0x331   :  { %v514_v52 = vpop.permute.xlu1 %513  ;;  %v516_v53 = vpop.permute.xlu0 %515 }
 0x332   :  { %v526_v54 = vmul.f32 %v1326_v14, %v514_v52  ;;  %v527_v55 = vmul.f32 %v1326_v14, %v516_v53 }
 0x334   :  { %v530_v56 = vpack.c.bf16 %v527_v55, %v526_v54 }
 0x335   :  { %v602_v57 = vpop.permute.xlu1 %601  ;;  %v604_v58 = vpop.permute.xlu0 %603 }
 0x336   :  { %1062 = vmatpush3.bf16.msra.mxu1 %v530_v56  ;;  %v614_v8 = vmul.f32 %v1333_v19, %v602_v57  ;;  %v615_v9 = vmul.f32 %v1333_v19, %v604_v58 }
 0x337   :  { %1063 = vmatprep.subr.bf16.mxu1 %v598_v46 }
 0x338   :  { %v618_v24 = vpack.c.bf16 %v615_v9, %v614_v8 }
 0x339   :  { %v535_v59 = vpop.permute.xlu1 %534  ;;  %v537_v60 = vpop.permute.xlu0 %536 }
 0x33a   :  { %v547_v18 = vmul.f32 %v1344_v28, %v535_v59  ;;  %v548_v20 = vmul.f32 %v1344_v28, %v537_v60 }
 0x33c   :  { %v551_v31 = vpack.c.bf16 %v548_v20, %v547_v18 }
 0x33d   :  { %v623_v61 = vpop.permute.xlu1 %622  ;;  %v625_v62 = vpop.permute.xlu0 %624 }
 0x33e   :  { %v635_v33 = vmul.f32 %v1355_v45, %v623_v61 }
 0x341   :  { %v556_v63 = vpop.permute.xlu1 %555  ;;  %v558_v0 = vpop.permute.xlu0 %557 }
 0x342   :  { %v568_v38 = vmul.f32 %v1362_v51, %v556_v63 }
 0x345   :  { %v644_v3 = vpop.permute.xlu1 %643  ;;  %v646_v4 = vpop.permute.xlu0 %645 }
 0x346   :  { %v657_v46 = vmul.f32 %v1373_v5, %v646_v4 }
 0x349   :  { %v577_v6 = vpop.permute.xlu1 %576  ;;  %v579_v7 = vpop.permute.xlu0 %578 }
 0x34a   :  { %v589_v49 = vmul.f32 %v1380_v11, %v577_v6  ;;  %v1131_v6 = vld [vmem:[%s1628_s6 + $0x1c] ss:$12 sps:$4 sm:$0xff]  }
 0x34d   :  { %v518_v12 = vpop.permute.xlu1 %517  ;;  %v520_v13 = vpop.permute.xlu0 %519 }
 0x34e   :  { %v528_v15 = vmul.f32 %v1326_v14, %v518_v12  ;;  %v529_v16 = vmul.f32 %v1326_v14, %v520_v13  ;;  %v636_v14 = vmul.f32 %v1355_v45, %v625_v62 }
 0x350   :  { %v531_v21 = vpack.c.bf16 %v529_v16, %v528_v15  ;;  %v639_v40 = vpack.c.bf16 %v636_v14, %v635_v33  ;;  %v1133_v15 = vld [vmem:[%s1628_s6 + $0x18] ss:$12 sps:$4 sm:$0xff]   ;;  %v1135_v16 = vld [vmem:[%s1628_s6 + $0x20] ss:$12 sps:$4 sm:$0xff]  }
 0x351   :  { %v606_v25 = vpop.permute.xlu1 %605  ;;  %v608_v26 = vpop.permute.xlu0 %607 }
 0x352   :  { %v616_v27 = vmul.f32 %v1333_v19, %v606_v25  ;;  %v617_v29 = vmul.f32 %v1333_v19, %v608_v26  ;;  %1064 = vmatpush3.bf16.msra.mxu1 %v531_v21  ;;  %v569_v19 = vmul.f32 %v1362_v51, %v558_v0 }
 0x353   :  { %1065 = vmatprep.subr.bf16.mxu1 %v618_v24 }
 0x354   :  { %v619_v32 = vpack.c.bf16 %v617_v29, %v616_v27  ;;  %v572_v43 = vpack.c.bf16 %v569_v19, %v568_v38 }
 0x355   :  { %v539_v34 = vpop.permute.xlu1 %538  ;;  %v541_v35 = vpop.permute.xlu0 %540 }
 0x356   :  { %v549_v36 = vmul.f32 %v1344_v28, %v539_v34  ;;  %v550_v37 = vmul.f32 %v1344_v28, %v541_v35  ;;  %1066 = vmatpush3.bf16.msra.mxu1 %v551_v31  ;;  %v656_v28 = vmul.f32 %v1373_v5, %v644_v3  ;;  %v1128_v3 = vld [vmem:[%s1628_s6] ss:$12 sps:$4 sm:$0xff]  }
 0x357   :  { %1067 = vmatprep.subr.bf16.mxu1 %v619_v32 }
 0x358   :  { %v552_v39 = vpack.c.bf16 %v550_v37, %v549_v36  ;;  %v660_v52 = vpack.c.bf16 %v657_v46, %v656_v28 }
 0x359   :  { %v627_v41 = vpop.permute.xlu1 %626  ;;  %v629_v42 = vpop.permute.xlu0 %628 }
 0x35a   :  { %v637_v10 = vmul.f32 %v1355_v45, %v627_v41  ;;  %v638_v17 = vmul.f32 %v1355_v45, %v629_v42  ;;  %1068 = vmatpush3.bf16.msra.mxu1 %v552_v39  ;;  %v590_v45 = vmul.f32 %v1380_v11, %v579_v7 }
 0x35b   :  { %1069 = vmatprep.subr.bf16.mxu1 %v639_v40 }
 0x35c   :  { %v640_v44 = vpack.c.bf16 %v638_v17, %v637_v10  ;;  %v593_v57 = vpack.c.bf16 %v590_v45, %v589_v49 }
 0x35d   :  { %v560_v22 = vpop.permute.xlu1 %559  ;;  %v562_v23 = vpop.permute.xlu0 %561 }
 0x35e   :  { %v570_v47 = vmul.f32 %v1362_v51, %v560_v22  ;;  %v571_v48 = vmul.f32 %v1362_v51, %v562_v23  ;;  %1070 = vmatpush3.bf16.msra.mxu1 %v572_v43 }
 0x35f   :  { %1071 = vmatprep.subr.bf16.mxu1 %v640_v44 }
 0x360   :  { %v573_v50 = vpack.c.bf16 %v571_v48, %v570_v47 }
 0x361   :  { %v648_v53 = vpop.permute.xlu1 %647  ;;  %v650_v54 = vpop.permute.xlu0 %649 }
 0x362   :  { %v658_v55 = vmul.f32 %v1373_v5, %v648_v53  ;;  %v659_v56 = vmul.f32 %v1373_v5, %v650_v54  ;;  %1072 = vmatpush3.bf16.msra.mxu1 %v573_v50 }
 0x363   :  { %1073 = vmatprep.subr.bf16.mxu1 %v660_v52 }
 0x364   :  { %v661_v58 = vpack.c.bf16 %v659_v56, %v658_v55 }
 0x365   :  { %v581_v59 = vpop.permute.xlu1 %580  ;;  %v583_v51 = vpop.permute.xlu0 %582 }
 0x366   :  { %v591_v60 = vmul.f32 %v1380_v11, %v581_v59  ;;  %v592_v61 = vmul.f32 %v1380_v11, %v583_v51  ;;  %1074 = vmatpush3.bf16.msra.mxu1 %v593_v57 }
 0x367   :  { %1075 = vmatprep.subr.bf16.mxu1 %v661_v58 }
 0x368   :  { %v594_v62 = vpack.c.bf16 %v592_v61, %v591_v60 }
 0x369   :  { %v665_v63 = vpop.permute.xlu1 %664  ;;  %v667_v0 = vpop.permute.xlu0 %666 }
 0x36a   :  { %v677_v5 = vmul.f32 %v1391_v30, %v665_v63  ;;  %v678_v4 = vmul.f32 %v1391_v30, %v667_v0  ;;  %1076 = vmatpush3.bf16.msra.mxu1 %v594_v62 }
 0x36c   :  { %v681_v7 = vpack.c.bf16 %v678_v4, %v677_v5 }
 0x36d   :  { %v669_v11 = vpop.permute.xlu1 %668  ;;  %804 = vmatmul.mubr.bf16.vlgmr.msra.gmra.mrb[4].mxu1 %v1128_v3  ;;  %v671_v8 = vpop.permute.xlu0 %670 }
 0x36e   :  { %v679_v9 = vmul.f32 %v1391_v30, %v669_v11  ;;  %v680_v12 = vmul.f32 %v1391_v30, %v671_v8  ;;  %1101 = vmatprep.subr.bf16.mxu0 %v681_v7  ;;  %811 = vmatprep.mubr.bf16.mxu1 %v1131_v6 }
 0x36f   :  { %1102 = vmatpush3.bf16.msra.mxu0 %v681_v7 }
 0x370   :  { %v682_v13 = vpack.c.bf16 %v680_v12, %v679_v9 }
 0x372   :  { %1103 = vmatprep.subr.bf16.mxu0 %v682_v13 }
 0x373   :  { %1104 = vmatpush3.bf16.msra.mxu0 %v682_v13 }
 0x375   :  { %812 = vmatmul.mubr.bf16.gmra.mrb[8].mxu1 %v1133_v15 }
 0x376   :  { %1106 = vmatmul.mubr.msk.bf16.vlgmr.msra.gmra.mrb[8].mxu0 %vm292_vm0, %v1135_v16 }
 0x37e   :  { %v718_v30 = vpop.permute.xlu1 %717  ;;  %v723_v27 = vpop.permute.xlu0 %722 }
 0x382   :  { %v728_v29 = vpop.permute.xlu1 %727  ;;  %v733_v10 = vpop.permute.xlu0 %732 }
 0x440   :  { %v1077_v18 = vpop.f32.mrb[4].mxu1 }
 0x441   :  { %v1078_v20 = vpop.f32.mrb[5].mxu1 }
 0x442   :  { %v1079_v21 = vadd.f32 %v1078_v20, %v1077_v18  ;;  %v1080_v24 = vpop.f32.mrb[6].mxu1 }
 0x443   :  { %v1081_v25 = vpop.f32.mrb[7].mxu1 }
 0x444   :  { %v1082_v26 = vadd.f32 %v1081_v25, %v1080_v24  ;;  %v806_v14 = vadd.f32 %v1079_v21, %v718_v30 }
 0x446   :  { %v809_v39 = vadd.f32 %v1082_v26, %v723_v27  ;;  %v878_v26 = vld [vmem:[%s1630_s8 + $0x8] sm:$0xff] }
 0x448   :  { %v1083_v31 = vpop.f32.mrb[8].mxu1 }
 0x449   :  { %v1084_v32 = vpop.f32.mrb[9].mxu1  ;;  %v1107_v33 = vpop.f32.mrb[8].mxu0 }
 0x44a   :  { %v1085_v34 = vadd.f32 %v1084_v32, %v1083_v31  ;;  %v1086_v35 = vpop.f32.mrb[10].mxu1  ;;  %v854_v36 = vpop.f32.mrb[9].mxu0 }
 0x44b   :  { %v855_v37 = vadd.f32 %v854_v36, %v806_v14  ;;  %v1087_v38 = vpop.f32.mrb[11].mxu1  ;;  %v1108_v19 = vpop.f32.mrb[10].mxu0 }
 0x44c   :  { %v814_v40 = vadd.f32 %v1085_v34, %v728_v29  ;;  %v1088_v41 = vadd.f32 %v1087_v38, %v1086_v35  ;;  %v857_v42 = vpop.f32.mrb[11].mxu0  ;;  %v877_v29 = vld [vmem:[%s1630_s8] sm:$0xff]  ;;  %v882_v34 = vld [vmem:[%s1631_s9 + $0x8] sm:$0xff] }
 0x44d   :  { %v869_v17 = vmax.f32 %v855_v37, 0.0  ;;  %v858_v43 = vadd.f32 %v857_v42, %v809_v39  ;;  %v881_v35 = vld [vmem:[%s1631_s9] sm:$0xff]  ;;  %v880_v37 = vld [vmem:[%s1630_s8 + $0x18] sm:$0xff] }
 0x44e   :  { %v863_v44 = vadd.f32 %v1107_v33, %v814_v40  ;;  %v817_v28 = vadd.f32 %v1088_v41, %v733_v10  ;;  %v879_v40 = vld [vmem:[%s1630_s8 + $0x10] sm:$0xff] }
 0x44f   :  { %v1555_v46 = vadd.f32 %v869_v17, %v1226_v1  ;;  %v870_v22 = vmax.f32 %v858_v43, 0.0  ;;  %v1152_v1 = vld [vmem:[%s1622_s0 + $0x18] sm:$0xff] }
 0x450   :  { %v866_v23 = vadd.f32 %v1108_v19, %v817_v28  ;;  %v871_v45 = vmax.f32 %v863_v44, 0.0  ;;  %v884_v43 = vld [vmem:[%s1631_s9 + $0x18] sm:$0xff]  ;;  %v883_v44 = vld [vmem:[%s1631_s9 + $0x10] sm:$0xff] }
 0x451   :  { %v1558_v47 = vadd.f32 %v870_v22, %v1235_v2  ;;  %885 = vadd.xlane.f32.xlu1 %v1555_v46  ;;  %v897_v50 = vmul.f32 %v1555_v46, %v1555_v46  ;;  %v1153_v2 = vld [vmem:[%s1622_s0 + $0x10] sm:$0xff] }
 0x452   :  { %v872_v48 = vmax.f32 %v866_v23, 0.0  ;;  %v1574_v53 = vadd.f32 %v1153_v2, %v871_v45 }
 0x453   :  { %887 = vadd.xlane.f32.xlu0 %v1558_v47  ;;  %v898_v49 = vmul.f32 %v1558_v47, %v1558_v47 }
 0x454   :  { %v1569_v52 = vadd.f32 %v1152_v1, %v872_v48  ;;  %v899_v55 = vmul.f32 %v1574_v53, %v1574_v53 }
 0x455   :  { %903 = vadd.xlane.f32.xlu1 %v898_v49 }
 0x456   :  { %v900_v54 = vmul.f32 %v1569_v52, %v1569_v52 }
 0x457   :  { %901 = vadd.xlane.f32.xlu0 %v897_v50 }
 0x459   :  { %891 = vadd.xlane.f32.xlu1 %v1569_v52 }
 0x45b   :  { %889 = vadd.xlane.f32.xlu0 %v1574_v53 }
 0x45d   :  { %907 = vadd.xlane.f32.xlu1 %v900_v54 }
 0x45f   :  { %905 = vadd.xlane.f32.xlu0 %v899_v55 }
 0x4de   :  { %v886_v56 = vpop.xlane.xlu1 %885 }
 0x4df   :  { %v893_v58 = vmul.f32 0.0078125, %v886_v56 }
 0x4e0   :  { %v888_v57 = vpop.xlane.xlu0 %887 }
 0x4e1   :  { %v894_v59 = vmul.f32 0.0078125, %v888_v57  ;;  %v913_v63 = vmul.f32 %v893_v58, %v893_v58 }
 0x4e2   :  { %v904_v51 = vpop.xlane.xlu1 %903 }
 0x4e3   :  { %v914_v60 = vmul.f32 %v894_v59, %v894_v59  ;;  %v910_v61 = vmul.f32 0.0078125, %v904_v51 }
 0x4e4   :  { %v902_v62 = vpop.xlane.xlu0 %901 }
 0x4e5   :  { %v918_v0 = vsub.f32 %v910_v61, %v914_v60  ;;  %v909_v3 = vmul.f32 0.0078125, %v902_v62 }
 0x4e6   :  { %v892_v5 = vpop.xlane.xlu1 %891 }
 0x4e7   :  { %v922_v4 = vadd.f32 1e-05, %v918_v0  ;;  %v917_v6 = vsub.f32 %v909_v3, %v913_v63  ;;  %v896_v7 = vmul.f32 0.0078125, %v892_v5 }
 0x4e8   :  { %v890_v11 = vpop.xlane.xlu0 %889 }
 0x4e9   :  { %1144 = vrsqrt.f32 %v922_v4  ;;  %v921_v8 = vadd.f32 1e-05, %v917_v6  ;;  %v895_v9 = vmul.f32 0.0078125, %v890_v11  ;;  %v916_v13 = vmul.f32 %v896_v7, %v896_v7 }
 0x4ea   :  { %v908_v12 = vpop.xlane.xlu1 %907 }
 0x4eb   :  { %1146 = vrsqrt.f32 %v921_v8  ;;  %v912_v15 = vmul.f32 0.0078125, %v908_v12  ;;  %v915_v18 = vmul.f32 %v895_v9, %v895_v9 }
 0x4ec   :  { %v906_v16 = vpop.xlane.xlu0 %905 }
 0x4ed   :  { %v920_v20 = vsub.f32 %v912_v15, %v916_v13  ;;  %v911_v30 = vmul.f32 0.0078125, %v906_v16 }
 0x4ef   :  { %v924_v21 = vadd.f32 1e-05, %v920_v20  ;;  %v919_v24 = vsub.f32 %v911_v30, %v915_v18 }
 0x4f1   :  { %1148 = vrsqrt.f32 %v924_v21  ;;  %v923_v25 = vadd.f32 1e-05, %v919_v24 }
 0x4f3   :  { %v1145_v27 = vpop.eup %1144  ;;  %1150 = vrsqrt.f32 %v923_v25 }
 0x4f4   :  { %v930_v31 = vmul.f32 %v1145_v27, %v878_v26 }
 0x4f5   :  { %v1147_v32 = vpop.eup %1146 }
 0x4f6   :  { %948 = vperm.xlu1 %1119, %v930_v31   ;;  %v934_v33 = vmul.f32 %v930_v31, %v894_v59  ;;  %v929_v14 = vmul.f32 %v1147_v32, %v877_v29 }
 0x4f8   :  { %943 = vperm.xlu0 %1118, %v929_v14   ;;  %v933_v36 = vmul.f32 %v929_v14, %v893_v58  ;;  %v938_v38 = vsub.f32 %v882_v34, %v934_v33 }
 0x4fa   :  { %v937_v19 = vsub.f32 %v881_v35, %v933_v36 }
 0x4fb   :  { %v1149_v39 = vpop.eup %1148 }
 0x4fc   :  { %972 = vperm.xlu0 %1118, %v938_v38   ;;  %967 = vperm.xlu1 %1119, %v937_v19   ;;  %v932_v41 = vmul.f32 %v1149_v39, %v880_v37 }
 0x4fd   :  { %v1151_v42 = vpop.eup %1150 }
 0x4fe   :  { %v931_v10 = vmul.f32 %v1151_v42, %v879_v40  ;;  %v936_v17 = vmul.f32 %v932_v41, %v896_v7 }
 0x500   :  { %958 = vperm.xlu0 %1118, %v932_v41   ;;  %953 = vperm.xlu1 %1119, %v931_v10   ;;  %v935_v28 = vmul.f32 %v931_v10, %v895_v9  ;;  %v940_v22 = vsub.f32 %v884_v43, %v936_v17 }
 0x502   :  { %v939_v23 = vsub.f32 %v883_v44, %v935_v28 }
 0x504   :  { %982 = vperm.xlu0 %1118, %v940_v22   ;;  %977 = vperm.xlu1 %1119, %v939_v23  }
 0x575   :  { %v949_v48 = vpop.permute.xlu1 %948 }
 0x576   :  { %v962_v45 = vmul.f32 %v949_v48, %v1558_v47 }
 0x577   :  { %v944_v49 = vpop.permute.xlu0 %943 }
 0x578   :  { %v961_v50 = vmul.f32 %v944_v49, %v1555_v46 }
 0x57b   :  { %v968_v1 = vpop.permute.xlu1 %967  ;;  %v973_v2 = vpop.permute.xlu0 %972 }
 0x57c   :  { %v985_v54 = vadd.f32 %v968_v1, %v961_v50  ;;  %v986_v55 = vadd.f32 %v973_v2, %v962_v45 }
 0x57e   :  { %989 = vst [vmem:[%s1632_s10] sm:$0xff] %v985_v54  ;;  %990 = vst [vmem:[%s1632_s10 + $0x8] sm:$0xff] %v986_v55 }
 0x57f   :  { %v954_v56 = vpop.permute.xlu1 %953  ;;  %v959_v57 = vpop.permute.xlu0 %958 }
 0x580   :  { %v963_v58 = vmul.f32 %v954_v56, %v1574_v53  ;;  %v964_v47 = vmul.f32 %v959_v57, %v1569_v52 }
 0x583   :  { %v978_v59 = vpop.permute.xlu1 %977  ;;  %v983_v46 = vpop.permute.xlu0 %982 }
 0x584   :  { %v987_v51 = vadd.f32 %v978_v59, %v963_v58  ;;  %v988_v60 = vadd.f32 %v983_v46, %v964_v47 }
 0x586   :  { %991 = vst [vmem:[%s1632_s10 + $0x10] sm:$0xff] %v987_v51  ;;  %992 = vst [vmem:[%s1632_s10 + $0x18] sm:$0xff] %v988_v60 }

</bundles_post_ra>
